<compile_context>
chip_gen: v7x
topology: tpu7x:2x2x1
jax: 0.10.0
libtpu: 0.0.40
codegen_flags: <defaults>
</compile_context>

<pallas_src>
from enum import Enum

import jax
import jax.numpy as jnp
from jax.experimental import pallas as pl
from jax.experimental.pallas import tpu as pltpu


# ---------------------------------------------------------------------------
# pipe_split marker (no-op: there is no active pipeline tracer here)
# ---------------------------------------------------------------------------
# TODO(synk): torch.fx pipeline tracing / split_module has no Pallas
# equivalent; pipe_split stays a pure marker no-op.
_pipeline_tracer = None


def pipe_split():
    if _pipeline_tracer is not None and hasattr(_pipeline_tracer, "graph"):
        _pipeline_tracer.graph.call_function(pipe_split, (), {})


# ---------------------------------------------------------------------------
# Helpers: padding / tile selection
# ---------------------------------------------------------------------------
def _round_up(x, m):
    return (x + m - 1) // m * m


def _vmem_caps():
    """Return (vmem_limit_bytes, tile_budget_bytes), generation-aware."""
    cap = None
    try:
        info = pltpu.get_tpu_info()
        for attr in ("vmem_capacity_bytes", "vmem_bytes"):
            if hasattr(info, attr):
                cap = int(getattr(info, attr))
                break
    except Exception:
        cap = None
    if cap is None or cap <= 0:
        cap = 64 * 1024 * 1024  # conservative: v7x per-TensorCore VMEM
    # Leave headroom for compiler-internal scratch.
    limit = min(int(cap * 0.75), cap - (8 << 20))
    limit = max(limit, 32 * 1024 * 1024)
    budget = int(limit * 0.85)
    return limit, budget


def _largest_divisor_tile(dim, cap, mult=128):
    """Largest multiple of `mult` that divides `dim` (a multiple of `mult`)
    and is <= cap.  Guarantees no extra padding beyond the 128-multiple pad."""
    cap = max(mult, min(cap, dim))
    best = mult
    t = mult
    while t <= cap:
        if dim % t == 0:
            best = t
        t += mult
    return best


def _select_tiles(Mp0, Kp, Np, budget):
    # tm: full (padded) M if small; else a candidate minimizing M padding.
    if Mp0 <= 512:
        tm = Mp0
    else:
        cands = (512, 384, 256, 128)
        tm = min(cands, key=lambda c: (_round_up(Mp0, c) - Mp0, -c))
    n_i_blocks = _round_up(Mp0, tm) // tm

    # tk: as large as possible (fewest K steps -> fewest weight passes and
    # grid-step overheads); must divide the pre-padded Kp.
    tk = _largest_divisor_tile(Kp, 2048)

    # tn: large and lane-dense, but keep >= 2 j-blocks when the i axis has a
    # single block so both TensorCores get work on v7x (neutral on v5e/v6e).
    tn_cap = 512
    if n_i_blocks == 1 and Np >= 256:
        tn_cap = min(tn_cap, Np // 2)
    tn = _largest_divisor_tile(Np, tn_cap)

    def footprint(tm_, tn_, tk_):
        # Double-buffered x (bf16), w (bf16), bias (f32), out (f32) tiles.
        return 2 * (tm_ * tk_ * 2 + tk_ * tn_ * 2 + tn_ * 4 + tm_ * tn_ * 4)

    # Shrink K tile first, then N, then M, staying on dividing tile sizes.
    while footprint(tm, tn, tk) > budget and tk > 128:
        tk = _largest_divisor_tile(Kp, tk - 128)
    while footprint(tm, tn, tk) > budget and tn > 128:
        tn = _largest_divisor_tile(Np, tn - 128)
    while footprint(tm, tn, tk) > budget and tm > 16:
        tm = max(16, tm // 2)

    return tm, tn, tk


# ---------------------------------------------------------------------------
# Tiled Pallas kernel for the wrapped module (Linear: y = x @ Wt + b)
# ---------------------------------------------------------------------------
def _linear_kernel(x_ref, wt_ref, b_ref, o_ref):
    # x_ref: (tm, tk) bf16   wt_ref: (tk, tn) bf16
    # b_ref: (1,  tn) f32    o_ref:  (tm, tn) f32  (VMEM-resident across k:
    # output block index (i, j) is independent of k and k is the innermost
    # "arbitrary" grid axis -- preserve that invariant if changing the grid.)
    k = pl.program_id(2)

    @pl.when(k == 0)
    def _():
        o_ref[...] = jnp.broadcast_to(b_ref[...], o_ref.shape)

    o_ref[...] += jnp.dot(
        x_ref[...], wt_ref[...], preferred_element_type=jnp.float32
    )


def pallas_linear(x2d, wt_padded_bf16, bias_padded_f32, n_out):
    """x2d: [M, K] (any float dtype); wt_padded_bf16: [Kp, Np] bf16 (pre-
    transposed, pre-padded); bias_padded_f32: [1, Np] f32.  Returns f32
    [M, n_out]."""
    M, K = x2d.shape
    Kp, Np = wt_padded_bf16.shape
    assert Kp >= K and Kp % 128 == 0 and Np % 128 == 0

    vmem_limit, tile_budget = _vmem_caps()

    Mp0 = _round_up(max(M, 16), 16)  # bf16 packs 16 sublanes per vreg
    tm, tn, tk = _select_tiles(Mp0, Kp, Np, tile_budget)
    Mp = _round_up(Mp0, tm)

    # Only the activation is cast/padded per call (weight/bias were prepped
    # once at module init).
    x_p = x2d.astype(jnp.bfloat16)
    if (Mp, Kp) != (M, K):
        x_p = jnp.pad(x_p, ((0, Mp - M), (0, Kp - K)))

    grid = (Mp // tm, Np // tn, Kp // tk)  # K innermost (reduction)

    # TODO(synk): if profiling on v5e shows exposed weight DMA, add
    # pipeline_mode=pl.Buffered(3) on the weight BlockSpec.
    out = pl.pallas_call(
        _linear_kernel,
        out_shape=jax.ShapeDtypeStruct((Mp, Np), jnp.float32),
        grid=grid,
        in_specs=[
            pl.BlockSpec((tm, tk), lambda i, j, k: (i, k)),
            pl.BlockSpec((tk, tn), lambda i, j, k: (k, j)),
            pl.BlockSpec((1, tn), lambda i, j, k: (0, j)),
        ],
        out_specs=pl.BlockSpec((tm, tn), lambda i, j, k: (i, j)),
        compiler_params=pltpu.CompilerParams(
            dimension_semantics=("parallel", "parallel", "arbitrary"),
            vmem_limit_bytes=int(vmem_limit),
        ),
    )(x_p, wt_padded_bf16, bias_padded_f32)

    if (Mp, Np) != (M, n_out):
        out = out[:M, :n_out]
    return out


# ---------------------------------------------------------------------------
# Wrapped module: a Linear whose forward runs the Pallas kernel
# ---------------------------------------------------------------------------
class LinearModule:
    def __init__(self, in_features, out_features, key):
        k_w, k_b = jax.random.split(key)
        bound = 1.0 / (in_features ** 0.5)
        # PyTorch nn.Linear stores weight as [out, in]; keep it for reference.
        self.weight = jax.random.uniform(
            k_w, (out_features, in_features), jnp.float32, -bound, bound
        )
        self.bias = jax.random.uniform(
            k_b, (out_features,), jnp.float32, -bound, bound
        )
        self.in_features = in_features
        self.out_features = out_features

        # One-time weight prep: transpose to [in, out], cast to bf16, pad to
        # 128-multiples.  The forward path never re-casts / re-pads / re-
        # transposes the weight in HBM.
        Kp = _round_up(in_features, 128)
        Np = _round_up(out_features, 128)
        wt = jnp.asarray(self.weight.T)  # [in, out]
        wt = jnp.pad(wt, ((0, Kp - in_features), (0, Np - out_features)))
        self.wt_bf16 = jnp.asarray(wt.astype(jnp.bfloat16))  # [Kp, Np]
        b = self.bias.astype(jnp.float32).reshape(1, out_features)
        self.bias_pad = jnp.pad(b, ((0, 0), (0, Np - out_features)))  # [1, Np]

    def __call__(self, x):
        # x: [..., in_features]  ->  [..., out_features]
        lead = x.shape[:-1]
        x2d = x.reshape(-1, x.shape[-1])
        y2d = pallas_linear(x2d, self.wt_bf16, self.bias_pad, self.out_features)
        return y2d.reshape(*lead, self.out_features)


# ---------------------------------------------------------------------------
# PipeSplitWrapper — faithful port of the PyTorch module's forward semantics
# ---------------------------------------------------------------------------
class PipeSplitWrapper:
    class SplitPoint(Enum):
        BEGINNING = 1
        END = 2

    def __init__(self, mod, split_point: "PipeSplitWrapper.SplitPoint" = None):
        if split_point is None:
            split_point = PipeSplitWrapper.SplitPoint.BEGINNING
        self.mod = mod
        self.split_point = split_point

    def __call__(self, *args, **kwargs):
        return self.forward(*args, **kwargs)

    def forward(self, *args, **kwargs):
        try:
            if self.split_point == self.SplitPoint.BEGINNING:
                pipe_split()
            return self.mod(*args, **kwargs)
        finally:
            if self.split_point == self.SplitPoint.END:
                pipe_split()


# ---------------------------------------------------------------------------
if __name__ == "__main__":
    key = jax.random.PRNGKey(0)
    k_x, k_mod = jax.random.split(key)

    # Small but lane-friendly shapes: hidden/out are multiples of 128 so the
    # weight needs no padding and the output tiles are lane-dense.
    batch, seq, hidden, out_features = 2, 8, 512, 256
    x = jax.random.normal(k_x, (batch, seq, hidden), jnp.float32)

    inner = LinearModule(hidden, out_features, k_mod)
    wrapped = PipeSplitWrapper(inner, PipeSplitWrapper.SplitPoint.BEGINNING)

    y = wrapped(x)
    jax.block_until_ready(y)
    assert y.shape == (batch, seq, out_features)

    # Reference with matching numerics (bf16 operands, f32 accumulation).
    x2d = x.reshape(-1, hidden)
    wt_bf16_ref = inner.weight.T.astype(jnp.bfloat16)
    y_ref_bf16 = (
        jnp.dot(
            x2d.astype(jnp.bfloat16),
            wt_bf16_ref,
            preferred_element_type=jnp.float32,
        )
        + inner.bias
    ).reshape(batch, seq, out_features)
    assert jnp.allclose(y, y_ref_bf16, atol=1e-3, rtol=1e-3)

    # Loose check against the pure-f32 Linear (bf16 operand rounding only).
    y_ref_f32 = x @ inner.weight.T + inner.bias
    assert jnp.allclose(y, y_ref_f32, atol=5e-2, rtol=5e-2)

    print("KERNEL_OK")
</pallas_src>

<mosaic_0001>
module attributes {stable_mosaic.version = 11 : i64} {
  func.func @_linear_kernel(%arg0: i32, %arg1: i32, %arg2: i32, %arg3: memref<16x512xbf16, #tpu.memory_space<vmem>>, %arg4: memref<512x128xbf16, #tpu.memory_space<vmem>>, %arg5: memref<1x128xf32, #tpu.memory_space<vmem>>, %arg6: memref<16x128xf32, #tpu.memory_space<vmem>>) attributes {dimension_semantics = [#tpu.dimension_semantics<parallel>, #tpu.dimension_semantics<parallel>, #tpu.dimension_semantics<arbitrary>], iteration_bounds = array<i64: 1, 2, 1>, scalar_prefetch = 0 : i64, scratch_operands = 0 : i64, tpu.core_type = #tpu.core_type<tc>, window_params = [{transform_indices = @transform_0, window_bounds = array<i64: 16, 512>}, {transform_indices = @transform_1, window_bounds = array<i64: 512, 128>}, {transform_indices = @transform_2, window_bounds = array<i64: 1, 128>}, {transform_indices = @transform_3, window_bounds = array<i64: 16, 128>}]} {
    %c0_i32 = arith.constant 0 : i32
    %0 = arith.cmpi eq, %arg2, %c0_i32 : i32
    %1 = arith.extui %0 : i1 to i32
    %c0_i32_0 = arith.constant 0 : i32
    %2 = arith.cmpi ne, %1, %c0_i32_0 : i32
    scf.if %2 {
      %c0_8 = arith.constant 0 : index
      %c0_9 = arith.constant 0 : index
      %9 = vector.load %arg5[%c0_8, %c0_9] : memref<1x128xf32, #tpu.memory_space<vmem>>, vector<1x128xf32>
      %10 = vector.shape_cast %9 : vector<1x128xf32> to vector<1x128xf32>
      %11 = vector.broadcast %10 : vector<1x128xf32> to vector<16x128xf32>
      %c0_10 = arith.constant 0 : index
      %c0_11 = arith.constant 0 : index
      %12 = vector.load %arg6[%c0_10, %c0_11] : memref<16x128xf32, #tpu.memory_space<vmem>>, vector<16x128xf32>
      tpu.vector_store %arg6[%c0_10, %c0_11], %11 {strides = array<i32>} : memref<16x128xf32, #tpu.memory_space<vmem>>, vector<16x128xf32>,
    } else {
    }
    %c0 = arith.constant 0 : index
    %c0_1 = arith.constant 0 : index
    %3 = vector.load %arg6[%c0, %c0_1] : memref<16x128xf32, #tpu.memory_space<vmem>>, vector<16x128xf32>
    %c0_2 = arith.constant 0 : index
    %c0_3 = arith.constant 0 : index
    %4 = vector.load %arg3[%c0_2, %c0_3] : memref<16x512xbf16, #tpu.memory_space<vmem>>, vector<16x512xbf16>
    %c0_4 = arith.constant 0 : index
    %c0_5 = arith.constant 0 : index
    %5 = vector.load %arg4[%c0_4, %c0_5] : memref<512x128xbf16, #tpu.memory_space<vmem>>, vector<512x128xbf16>
    %cst = arith.constant dense<0.000000e+00> : vector<16x128xf32>
    %6 = tpu.matmul %4, %5, %cst {dimension_numbers = #tpu.dot_dimension_numbers<[1], [0], [0], [1], [0, 0, 1, 1], [], []>} : vector<16x512xbf16>, vector<512x128xbf16>, vector<16x128xf32> -> vector<16x128xf32>
    %7 = arith.addf %3, %6 : vector<16x128xf32>
    %c0_6 = arith.constant 0 : index
    %c0_7 = arith.constant 0 : index
    %8 = vector.load %arg6[%c0_6, %c0_7] : memref<16x128xf32, #tpu.memory_space<vmem>>, vector<16x128xf32>
    tpu.vector_store %arg6[%c0_6, %c0_7], %7 {strides = array<i32>} : memref<16x128xf32, #tpu.memory_space<vmem>>, vector<16x128xf32>,
    return
  }
  func.func @transform_0(%arg0: i32, %arg1: i32, %arg2: i32) -> (i32, i32) {
    %c0_i32 = arith.constant 0 : i32
    return %arg0, %arg2 : i32, i32
  }
  func.func @transform_1(%arg0: i32, %arg1: i32, %arg2: i32) -> (i32, i32) {
    %c0_i32 = arith.constant 0 : i32
    return %arg2, %arg1 : i32, i32
  }
  func.func @transform_2(%arg0: i32, %arg1: i32, %arg2: i32) -> (i32, i32) {
    %c0_i32 = arith.constant 0 : i32
    %c0_i32_0 = arith.constant 0 : i32
    return %c0_i32, %arg1 : i32, i32
  }
  func.func @transform_3(%arg0: i32, %arg1: i32, %arg2: i32) -> (i32, i32) {
    %c0_i32 = arith.constant 0 : i32
    return %arg0, %arg1 : i32, i32
  }
}

</mosaic_0001>

<bundles_post_ra>
// kernel: tpu_custom_call.1
= control target key start
LH: loop header
LB: loop body
LE: loop exit
PB: predicated region body
PF: predicated region fallthrough
CT: control target
= control target key end

     0   :  { %8 = vsyncpa [#allocation3], 0  ;;  %s1424_s0 = inlined_call_operand.hbm [shape: bf16[16,512], index: 0, kind: input, shape index: {}]   ;;  %s1425_s1 = inlined_call_operand.hbm [shape: bf16[512,256], index: 1, kind: input, shape index: {}]   ;;  %s1426_s2 = inlined_call_operand.vmem [shape: f32[1,256], index: 2, kind: input, shape index: {}]   ;;  %s1427_s3 = inlined_call_operand.hbm [shape: f32[16,256], index: 3, kind: output, shape index: {}]  }
   0x1   :  { %9 = vsyncpa [#allocation6], 0 }
   0x2   :  { %11 = vsyncpa [#allocation6 + $0x1], 0 }
   0x3   :  { %12 = vsyncpa [#allocation4], 0 }
   0x4   :  { %14 = vsyncpa [#allocation4 + $0x1], 0  ;;  %s1164_s12 = smov 0   ;;  %s1166_s13 = smov 0  }
   0x5   :  { %s1168_s14 = smov 0   ;;  %s1170_s15 = smov 0  }
   0x6   :  { %s1172_s16 = smov 0   ;;  %s1174_s17 = smov 0  }
   0x7 LB: > { %s772_s18 = sadd.s32 4294967295, %s1131_s17   ;;  %s773_s19 = sadd.s32 4294967294, %s1131_s17   ;;  %s1131_s17 = sphi %s1174_s17, %s20_s17   ;;  %s1127_s16 = sphi %s1172_s16, %s1453_s16   ;;  %s1123_s15 = sphi %s1170_s15, %s1452_s15   ;;  %s1119_s14 = sphi %s1168_s14, %s1451_s14   ;;  %s1115_s13 = sphi %s1166_s13, %s1450_s13   ;;  %s1111_s12 = sphi %s1164_s12, %s1449_s12  }
   0x8   : > { %p83_p0 = scmp.ne.s32.totalorder %s1119_s14, %s1115_s13  ;;  %p84_p1 = scmp.eq.s32.totalorder %s1131_s17, 0 }
   0x9   : > { %p89_p2 = scmp.ne.s32.totalorder %s1115_s13, %s1111_s12  ;;  %p1201_p3 = scmp.eq.s32.totalorder %s772_s18, 0 }
   0xa   : > { %p1205_p4 = por %p84_p1, %p83_p0  ;;  %p141_p5 = scmp.eq.s32.totalorder %s772_s18, 1 }
   0xb   : > { %s1434_s20 = scalar_select %p1201_p3, 1, 0 }
   0xc   : > { %p1211_p6 = por %p1201_p3, %p89_p2  ;;  %p147_p7 = scmp.eq.s32.totalorder %s773_s19, 1 }
   0xd   : > { %p1215_p8 = por %p141_p5, %p83_p0  ;;  %p774_p9 = scmp.ge.s32.totalorder %s1131_s17, 1 }
   0xe   : > { %s1436_s22 = scalar_select %p1211_p6, 1, 0 }
   0xf   : > { %s1437_s23 = scalar_select %p1215_p8, 1, 0 }
  0x10   : > { %p1220_p10 = por %p147_p7, %p89_p2  ;;  %p154_p11 = scmp.lt.s32.totalorder %s1131_s17, 3 }
  0x11   : > { %s1133_s26 = smov [#allocation2]   ;;  %p889_p1 = scmp.lt.s32.totalorder %s1131_s17, 2 }
  0x12   : > { %s1438_s24 = scalar_select %p1220_p10, 1, 0 }
  0x13   : > { %p1225_p12 = pnand %p774_p9, %p154_p11  ;;  %s172_s27 = sshll.u32 %s1133_s26, 4  ;;  %s1229_s27 = int_to_ptr.vmem [resolvable:$true] %s172_s27 }
  0x14   : > { %p1243_p2 = pnand %p889_p1, %p1205_p4  ;;  %s35_s30 = sadd.s32 1, %s1127_s16 }
  0x15   : > { %s1439_s25 = scalar_select %p1225_p12, 1, 0 }
  0x16   : > { %p876_p13 = pneg %p1225_p12  ;;  %s987_s6 = scalar_lea.hbm %s1424_s0, 512 }
  0x17   : > { %s1441_s29 = scalar_select %p1243_p2, 1, 0 }
  0x18   : > { %p1237_p5 = pnand %p876_p13, %p1201_p3  ;;  %p988_p7 = scmp.ne.s32.totalorder %s1424_s0, %s987_s6 }
  0x19   : > { %p994_p4 = scmp.lt.u32.totalorder %s987_s6, %s1424_s0 }
  0x1a   : > { %p989_p9 = pneg %p1237_p5 }
  0x1c   : > { %p990_p11 = pnand %p989_p9, %p988_p7 }
  0x1e   : > { %p991_p13 = pneg %p990_p11 }
  0x20   : > { %p996_p1 = pnand %p994_p4, %p991_p13 }
  0x22   : > { %999 = shalt.err (!%p996_p1)
}
  0x23   : > { %s1000_s11 = scalar_lea.vmem %s1229_s27, 512  ;;  %p1008_p6 = scmp.lt.s32.totalorder %s1229_s27, %s1229_s27 }
  0x24   : > { %p1001_p0 = scmp.ne.s32.totalorder %s1229_s27, %s1000_s11  ;;  %p1009_p3 = scmp.lt.s32.totalorder %s1000_s11, %s1000_s11 }
  0x26   : > { %p1003_p10 = pnand %p1001_p0, %p989_p9  ;;  %p1010_p12 = por %p1009_p3, %p1008_p6 }
  0x28   : > { %p1004_p8 = pneg %p1003_p10 }
  0x2a   : > { %p1011_p2 = pnand %p1010_p12, %p1004_p8 }
  0x2c   : > { %1014 = shalt.err (!%p1011_p2)
}
  0x2d   : > { %s1134_s18 = smov 256   ;;  %s1135_s19 = smov 16  }
  0x2e   : > { %879 = dma.hbm_to_vmem [thread:$0]  (!%p1237_p5), %s1424_s0, 512, %s1229_s27, [#allocation3], %s1134_s18, %s1134_s18, %s1135_s19  }
  0x2f   : > { %p37_p10 = scmp.ge.s32.totalorder %s35_s30, 2  ;;  %s76_s4 = sadd.s32 1, %s1119_s14 }
  0x30   : > { %s186_s5 = sand.u32 1, %s1119_s14   ;;  %s778_s8 = sshll.u32 %s1127_s16, 6 }
  0x31   : > { %s1455_s30 = smov (%p37_p10, %s35_s30), 0  ;;  %s777_s6 = sshll.u32 %s186_s5, 8 }
  0x32   : > { %s72_s7 = ssub.s32 %s1127_s16, %s1455_s30  ;;  %s1279_s28 = scalar_lea.hbm %s1425_s1, %s778_s8 }
  0x33   : > { %p74_p3 = scmp.eq.s32.totalorder %s72_s7, 0  ;;  %s190_s27 = scalar_lea.vmem [#allocation5], %s777_s6 }
  0x34   : > { %s199_s11 = sshll.u32 %s190_s27, 4  ;;  %s1286_s19 = scalar_lea.sflag [#allocation6], %s186_s5  ;;  %s1284_s11 = int_to_ptr.vmem [resolvable:$true] %s199_s11 }
  0x35   : > { %s1282_s18 = scalar_select %p74_p3, %s1119_s14, %s76_s4  }
  0x36   : > { %s1015_s21 = scalar_lea.hbm %s1279_s28, 4096  ;;  %p1442_p8 = scmp.ne.s32.totalorder %s1441_s29, 0 }
  0x37   : > { %p1016_p6 = scmp.ne.s32.totalorder %s1279_s28, %s1015_s21  ;;  %s1020_s8 = scalar_lea.hbm %s1425_s1, 8192 }
  0x38   : > { %p1017_p12 = pneg %p1442_p8  ;;  %p1021_p2 = scmp.lt.u32.totalorder %s1279_s28, %s1425_s1 }
  0x39   : > { %p1022_p7 = scmp.lt.u32.totalorder %s1020_s8, %s1015_s21  ;;  %p1024_p11 = scmp.lt.u32.totalorder %s1015_s21, %s1279_s28 }
  0x3a   : > { %p1018_p0 = pnand %p1017_p12, %p1016_p6 }
  0x3b   : > { %p1023_p9 = por %p1022_p7, %p1021_p2 }
  0x3c   : > { %p1019_p5 = pneg %p1018_p0 }
  0x3d   : > { %p1025_p13 = por %p1024_p11, %p1023_p9 }
  0x3f   : > { %p1026_p4 = pnand %p1025_p13, %p1019_p5 }
  0x41   : > { %1029 = shalt.err (!%p1026_p4)
}
  0x42   : > { %s1030_s4 = scalar_lea.vmem %s1284_s11, 4096  ;;  %s1136_s5 = smov [#allocation5]  }
  0x43   : > { %p1031_p1 = scmp.ne.s32.totalorder %s1284_s11, %s1030_s4  ;;  %s1035_s10 = sshll.u32 %s1136_s5, 4  ;;  %s1036_s10 = int_to_ptr.vmem [resolvable:$false] %s1035_s10 }
  0x44   : > { %s1037_s27 = scalar_lea.vmem %s1036_s10, 8192  ;;  %p1038_p6 = scmp.lt.s32.totalorder %s1284_s11, %s1036_s10 }
  0x45   : > { %p1033_p10 = pnand %p1031_p1, %p1017_p12  ;;  %p1039_p0 = scmp.lt.s32.totalorder %s1037_s27, %s1030_s4 }
  0x47   : > { %p1034_p3 = pneg %p1033_p10  ;;  %p1040_p2 = por %p1039_p0, %p1038_p6 }
  0x49   : > { %p1041_p7 = pnand %p1040_p2, %p1034_p3 }
  0x4b   : > { %1044 = shalt.err (!%p1041_p7)
}
  0x4c   : > { %s1137_s21 = smov 128   ;;  %s1138_s26 = smov 64  }
  0x4d   : > { %s1139_s7 = smov 4   ;;  %p1443_p12 = scmp.ne.s32.totalorder %s1439_s25, 0 }
  0x4e   : > { %883 = dma.hbm_to_vmem [thread:$0]  (!%p1442_p8), %s1279_s28, 4096, %s1284_s11, %s1286_s19, %s1137_s21, %s1138_s26, %s1139_s7  }
  0x4f   : > { %217 = sbr.rel (%p1443_p12) target bundleno = 363 (0x16b), region = 32  ;;  %p1444_p5 = scmp.ne.s32.totalorder (!%p1443_p12), %s1434_s20, 0 }
  0x56   : > { %1098 = dma.done.wait (%p1444_p5), [#allocation3], 512  }
  0x57   : > { %1100 = vsyncadd (%p1444_p5), [#allocation3], 4294966784  ;;  %s1321_s8 = sand.u32 1, %s1115_s13   ;;  %p1445_p8 = scmp.ne.s32.totalorder %s1436_s22, 0 }
  0x58   : > { %s781_s6 = sshll.u32 %s1321_s8, 8  ;;  %s224_s9 = scalar_lea.sflag [#allocation6], %s1321_s8 }
  0x59   : > { %s1325_s4 = scalar_lea.vmem [#allocation5], %s781_s6 }
  0x5a   : > { %1102 = dma.done.wait (%p1445_p8), %s224_s9, 4096  }
  0x5b   : > { %1104 = vsyncadd (%p1445_p8), %s224_s9, 4294963200  ;;  %v949_v0 = vld [vmem:[%s1325_s4 + $0x40] sm:$0xff]   ;;  %v953_v4 = vld [vmem:[%s1325_s4 + $0x48] sm:$0xff]   ;;  %p256_p9 = scmp.lt.s32.totalorder %s1123_s15, 1  ;;  %s782_s22 = sshll.u32 %s1321_s8, 4 }
  0x5c   : > { %v950_v1 = vld [vmem:[%s1325_s4 + $0xc0] sm:$0xff]   ;;  %824 = vmatprep.subr.bf16.mxu0 %v949_v0  ;;  %v954_v5 = vld [vmem:[%s1325_s4 + $0xc8] sm:$0xff]   ;;  %v957_v8 = vld [vmem:[%s1325_s4 + $0x50] sm:$0xff]   ;;  %s821_s11 = sshll.u32 %s1123_s15, 7  ;;  %s252_s19 = scalar_lea.vmem [#allocation7], %s782_s22 }
  0x5d   : > { %v951_v2 = vld [vmem:[%s1325_s4] sm:$0xff]   ;;  %846 = vmatprep.subr.bf16.mxu1 %v950_v1  ;;  %v955_v6 = vld [vmem:[%s1325_s4 + $0x8] sm:$0xff]   ;;  %v958_v9 = vld [vmem:[%s1325_s4 + $0xd0] sm:$0xff]   ;;  %s257_s20 = scalar_select %p256_p9, %s1123_s15, 1 }
  0x5e   : > { %v952_v3 = vld [vmem:[%s1325_s4 + $0x80] sm:$0xff]   ;;  %825 = vmatpush3.bf16.msra.mxu0 %v951_v2  ;;  %v956_v7 = vld [vmem:[%s1325_s4 + $0x88] sm:$0xff]   ;;  %v959_v10 = vld [vmem:[%s1325_s4 + $0x10] sm:$0xff]   ;;  %s658_s5 = sshll.u32 %s252_s19, 4  ;;  %s1373_s21 = scalar_lea.hbm %s1427_s3, %s821_s11  ;;  %s1375_s5 = int_to_ptr.vmem [resolvable:$true] %s658_s5 }
  0x5f   : > { %847 = vmatpush3.bf16.msra.mxu1 %v952_v3  ;;  %826 = vmatprep.subr.bf16.mxu0 %v953_v4  ;;  %v960_v11 = vld [vmem:[%s1325_s4 + $0x90] sm:$0xff]   ;;  %v961_v12 = vld [vmem:[%s1325_s4 + $0x58] sm:$0xff]   ;;  %v965_v16 = vld [vmem:[%s1325_s4 + $0x60] sm:$0xff]   ;;  %s258_s28 = scalar_lea.vmem %s1426_s2, %s257_s20  ;;  %s643_s15 = scalar_lea.sflag [#allocation4], %s1321_s8 }
  0x60   : > { %848 = vmatprep.subr.bf16.mxu1 %v954_v5  ;;  %v962_v13 = vld [vmem:[%s1325_s4 + $0xd8] sm:$0xff]   ;;  %v966_v17 = vld [vmem:[%s1325_s4 + $0xe0] sm:$0xff]   ;;  %v969_v20 = vld [vmem:[%s1325_s4 + $0x68] sm:$0xff]   ;;  %s1045_s26 = scalar_lea.vmem %s1375_s5, 256  ;;  %p1446_p13 = scmp.ne.s32.totalorder %s1437_s23, 0 }
  0x61   : > { %v963_v14 = vld [vmem:[%s1325_s4 + $0x18] sm:$0xff]   ;;  %v967_v18 = vld [vmem:[%s1325_s4 + $0x20] sm:$0xff]   ;;  %v970_v21 = vld [vmem:[%s1325_s4 + $0xe8] sm:$0xff]   ;;  %p1046_p11 = scmp.ne.s32.totalorder %s1375_s5, %s1045_s26  ;;  %s1140_s7 = smov [#allocation7]  }
  0x62   : > { %827 = vmatpush3.bf16.msra.mxu0 %v955_v6  ;;  %v964_v15 = vld [vmem:[%s1325_s4 + $0x98] sm:$0xff]   ;;  %v968_v19 = vld [vmem:[%s1325_s4 + $0xa0] sm:$0xff]   ;;  %v971_v22 = vld [vmem:[%s1325_s4 + $0x28] sm:$0xff]   ;;  %s1049_s6 = sshll.u32 %s1140_s7, 4  ;;  %s1050_s6 = int_to_ptr.vmem [resolvable:$false] %s1049_s6 }
  0x63   : > { %849 = vmatpush3.bf16.msra.mxu1 %v956_v7  ;;  %828 = vmatprep.subr.bf16.mxu0 %v957_v8  ;;  %v972_v23 = vld [vmem:[%s1325_s4 + $0xa8] sm:$0xff]   ;;  %v973_v24 = vld [vmem:[%s1325_s4 + $0x70] sm:$0xff]   ;;  %v977_v28 = vld [vmem:[%s1325_s4 + $0x78] sm:$0xff]   ;;  %p1047_p4 = pnand %p1046_p11, %p1446_p13  ;;  %s1051_s9 = scalar_lea.vmem %s1050_s6, 512 }
  0x64   : > { %850 = vmatprep.subr.bf16.mxu1 %v958_v9  ;;  %v974_v25 = vld [vmem:[%s1325_s4 + $0xf0] sm:$0xff]   ;;  %v978_v29 = vld [vmem:[%s1325_s4 + $0xf8] sm:$0xff]   ;;  %v783_v45 = vld [vmem:[%s258_s28] ss:$0 sm:$0xff]  ;;  %p1052_p10 = scmp.lt.s32.totalorder %s1375_s5, %s1050_s6  ;;  %p1053_p3 = scmp.lt.s32.totalorder %s1051_s9, %s1045_s26 }
  0x65   : > { %v975_v26 = vld [vmem:[%s1325_s4 + $0x30] sm:$0xff]   ;;  %v979_v30 = vld [vmem:[%s1325_s4 + $0x38] sm:$0xff]   ;;  %p1048_p1 = pneg %p1047_p4 }
  0x66   : > { %829 = vmatpush3.bf16.msra.mxu0 %v959_v10  ;;  %v976_v27 = vld [vmem:[%s1325_s4 + $0xb0] sm:$0xff]   ;;  %v980_v31 = vld [vmem:[%s1325_s4 + $0xb8] sm:$0xff]   ;;  %p1054_p6 = por %p1053_p3, %p1052_p10 }
  0x67   : > { %851 = vmatpush3.bf16.msra.mxu1 %v960_v11  ;;  %830 = vmatprep.subr.bf16.mxu0 %v961_v12  ;;  %v981_v32 = vld [vmem:[#allocation2] ss:$16 sps:$4 sm:$0xff]   ;;  %v983_v33 = vld [vmem:[#allocation2 + $0x4] ss:$16 sps:$4 sm:$0xff]   ;;  %v984_v34 = vld [vmem:[#allocation2 + $0x8] ss:$16 sps:$4 sm:$0xff]  }
  0x68   : > { %852 = vmatprep.subr.bf16.mxu1 %v962_v13  ;;  %v986_v35 = vld [vmem:[#allocation2 + $0xc] ss:$16 sps:$4 sm:$0xff]   ;;  %588 = vmatprep.mubr.bf16.mxu0 %v983_v33  ;;  %p1055_p0 = pnand %p1054_p6, %p1048_p1 }
  0x69   : > { %629 = vmatprep.mubr.bf16.mxu1 %v986_v35 }
  0x6a   : > { %831 = vmatpush3.bf16.msra.mxu0 %v963_v14 }
  0x6b   : > { %853 = vmatpush3.bf16.msra.mxu1 %v964_v15  ;;  %832 = vmatprep.subr.bf16.mxu0 %v965_v16 }
  0x6c   : > { %854 = vmatprep.subr.bf16.mxu1 %v966_v17 }
  0x6e   : > { %833 = vmatpush3.bf16.msra.mxu0 %v967_v18 }
  0x6f   : > { %855 = vmatpush3.bf16.msra.mxu1 %v968_v19  ;;  %834 = vmatprep.subr.bf16.mxu0 %v969_v20 }
  0x70   : > { %856 = vmatprep.subr.bf16.mxu1 %v970_v21 }
  0x72   : > { %835 = vmatpush3.bf16.msra.mxu0 %v971_v22 }
  0x73   : > { %857 = vmatpush3.bf16.msra.mxu1 %v972_v23  ;;  %836 = vmatprep.subr.bf16.mxu0 %v973_v24 }
  0x74   : > { %858 = vmatprep.subr.bf16.mxu1 %v974_v25 }
  0x76   : > { %837 = vmatpush3.bf16.msra.mxu0 %v975_v26 }
  0x77   : > { %859 = vmatpush3.bf16.msra.mxu1 %v976_v27  ;;  %838 = vmatprep.subr.bf16.mxu0 %v977_v28 }
  0x78   : > { %860 = vmatprep.subr.bf16.mxu1 %v978_v29 }
  0x7a   : > { %839 = vmatpush3.bf16.msra.mxu0 %v979_v30 }
  0x7b   : > { %861 = vmatpush3.bf16.msra.mxu1 %v980_v31 }
  0x7d   : > { %589 = vmatmul.mubr.bf16.vlgmr.msra.gmra.mrb[0].mxu0 %v981_v32 }
  0x7e   : > { %630 = vmatmul.mubr.bf16.vlgmr.msra.gmra.mrb[0].mxu1 %v984_v34 }
 0x150   : > { %v840_v36 = vpop.f32.mrb[0].mxu0 }
 0x151   : > { %v862_v37 = vpop.f32.mrb[0].mxu1  ;;  %v841_v38 = vpop.f32.mrb[1].mxu0 }
 0x152   : > { %v842_v39 = vadd.f32 %v841_v38, %v840_v36  ;;  %v863_v40 = vpop.f32.mrb[1].mxu1  ;;  %v843_v41 = vpop.f32.mrb[2].mxu0 }
 0x153   : > { %v864_v42 = vadd.f32 %v863_v40, %v862_v37  ;;  %v865_v43 = vpop.f32.mrb[2].mxu1  ;;  %v844_v44 = vpop.f32.mrb[3].mxu0 }
 0x154   : > { %v845_v46 = vadd.f32 %v844_v44, %v843_v41  ;;  %v866_v47 = vpop.f32.mrb[3].mxu1 }
 0x155   : > { %v632_v48 = vadd.f32 %v864_v42, %v842_v39  ;;  %v867_v49 = vadd.f32 %v866_v47, %v865_v43 }
 0x157   : > { %v638_v50 = vadd.f32 %v783_v45, %v632_v48  ;;  %v635_v51 = vadd.f32 %v867_v49, %v845_v46 }
 0x159   : > { %640 = vst [vmem:[%s252_s19] sm:$0xff] %v638_v50  ;;  %v639_v52 = vadd.f32 %v783_v45, %v635_v51 }
 0x15b   : > { %641 = vst [vmem:[%s252_s19 + $0x8] sm:$0xff] %v639_v52 }
 0x15c   : > { %1058 = shalt.err (!%p1055_p0)
}
 0x15d   : > { %s1059_s4 = scalar_lea.hbm %s1373_s21, 256  ;;  %s1063_s25 = scalar_lea.hbm %s1427_s3, 512 }
 0x15e   : > { %p1060_p2 = scmp.ne.s32.totalorder %s1373_s21, %s1059_s4  ;;  %p1064_p5 = scmp.lt.u32.totalorder %s1373_s21, %s1427_s3 }
 0x15f   : > { %p1065_p8 = scmp.lt.u32.totalorder %s1063_s25, %s1059_s4  ;;  %p1067_p11 = scmp.lt.u32.totalorder %s1059_s4, %s1373_s21 }
 0x160   : > { %p1061_p7 = pnand %p1060_p2, %p1446_p13 }
 0x161   : > { %p1066_p9 = por %p1065_p8, %p1064_p5 }
 0x162   : > { %p1062_p12 = pneg %p1061_p7 }
 0x163   : > { %p1068_p4 = por %p1067_p11, %p1066_p9 }
 0x165   : > { %p1069_p1 = pnand %p1068_p4, %p1062_p12 }
 0x167   : > { %1072 = shalt.err (!%p1069_p1)
}
 0x168   : > { %s1141_s11 = smov 128   ;;  %s1142_s19 = smov 256  }
 0x169   : > { %s1143_s10 = smov 8  }
 0x16a   : > { %874 = dma.vmem_to_hbm [thread:$0]  (%p1446_p13), %s1375_s5, 256, %s1373_s21, %s643_s15, %s1141_s11, %s1142_s19, %s1143_s10  }
 0x16b PF: > { %s673_s27 = sand.u32 1, %s1111_s12   ;;  %p1447_p10 = scmp.ne.s32.totalorder %s1438_s24, 0 }
 0x16c   : > { %p1448_p3 = scmp.ge.s32.totalorder %s1131_s17, 2  ;;  %s674_s26 = scalar_lea.sflag [#allocation4], %s673_s27 }
 0x16e   : > { %p885_p6 = pnand %p1448_p3, %p1447_p10 }
 0x170   : > { %1106 = dma.done.wait (!%p885_p6), %s674_s26, 256  }
 0x171   : > { %1108 = vsyncadd (!%p885_p6), %s674_s26, 4294967040  ;;  %s20_s17 = sadd.s32 1, %s1131_s17   ;;  %s1449_s12 = smov %s1115_s13 }
 0x172   : > { %p17_p0 = scmp.ge.s32.totalorder %s20_s17, 4   ;;  %s1450_s13 = smov %s1119_s14 }
 0x173   : > { %s1451_s14 = smov %s1282_s18  ;;  %s1452_s15 = smov %s1127_s16 }
 0x174   : > { %s1453_s16 = smov %s1455_s30  ;;  %19 = sbr.rel (!%p17_p0) target bundleno = 7 (0x7), region = 90 }
 0x17b   :  { %679 = vsyncpa [#allocation3], 1 }
 0x17c   :  { %681 = vsyncpa [#allocation3 + $0x1], 1 }
 0x17d   :  { %682 = vsyncpa [#allocation6], 1 }
 0x17e   :  { %684 = vsyncpa [#allocation6 + $0x1], 1 }
 0x17f   :  { %685 = vsyncpa [#allocation4], 1 }
 0x180   :  { %687 = vsyncpa [#allocation4 + $0x1], 1 }

</bundles_post_ra>
